<compile_context>
chip_gen: v5e
topology: v5e:2x2
jax: 0.10.0
libtpu: 0.0.40
codegen_flags: <defaults>
</compile_context>

<pallas_src>
import functools

import jax
import jax.numpy as jnp
from jax.experimental import pallas as pl
from jax.experimental.pallas import tpu as pltpu


def _round_up(x, m):
    return ((x + m - 1) // m) * m


def _token_xent_kernel(logits_ref, targets_ref, loss_ref, count_ref, *,
                       pad_index, n_tokens, tile_rows):
    """One grid step: `tile_rows` flattened tokens x the full vocabulary."""
    i = pl.program_id(0)

    # Zero the resident SMEM accumulators on the first grid step.
    @pl.when(i == 0)
    def _():
        loss_ref[0, 0] = jnp.float32(0.0)
        count_ref[0, 0] = jnp.int32(0)

    logits = logits_ref[...].astype(jnp.float32)              # (TN, V) f32
    targets = targets_ref[...]                                # (TN, 1) int32
    tn, v = logits.shape

    # Valid = not the pad class AND inside the real token range (the last grid
    # block may run past n_tokens; those rows hold garbage -> mask them out).
    row_ids = jax.lax.broadcasted_iota(jnp.int32, (tn, 1), 0) + i * tile_rows
    valid = (targets != pad_index) & (row_ids < n_tokens)     # (TN, 1) bool

    # Gather logits[target] with a lane-iota one-hot compare (no native gather
    # on TPU); the compare + select + lane reduce all stay on VPU/XLU.
    lane_ids = jax.lax.broadcasted_iota(jnp.int32, (tn, v), 1)
    tgt_logit = jnp.sum(jnp.where(lane_ids == targets, logits, 0.0),
                        axis=1, keepdims=True)                # (TN, 1)

    # Numerically stable log-sum-exp over the vocab (lane) axis.
    m = jnp.max(logits, axis=1, keepdims=True)                # (TN, 1)
    lse = m + jnp.log(jnp.sum(jnp.exp(logits - m), axis=1, keepdims=True))

    per_token = lse - tgt_logit                               # (TN, 1)

    # Masked accumulation into the resident scalar outputs.
    loss_ref[0, 0] += jnp.sum(jnp.where(valid, per_token, 0.0))
    count_ref[0, 0] += jnp.sum(valid.astype(jnp.int32))


class TokenCrossEntropyLoss:
    """JAX/Pallas port of the PyTorch TokenCrossEntropyLoss (forward only)."""

    def __init__(self, pad_index=0):
        self.pad_index = pad_index

    def __call__(self, outputs, targets, *, tile_rows=None):
        B, S, V = outputs.shape
        n_tokens = B * S
        logits = outputs.reshape(n_tokens, V)
        tgt = targets.reshape(n_tokens, 1).astype(jnp.int32)

        if tile_rows is None:
            # Two pipeline buffers of the (tile_rows, V) logits tile must fit a
            # budget that leaves plenty of headroom even on v7x (64 MiB VMEM).
            itemsize = jnp.dtype(outputs.dtype).itemsize
            budget_bytes = 8 * 1024 * 1024                    # per logits buffer
            tr = budget_bytes // max(1, V * itemsize)
            tile_rows = max(8, min(2048, (tr // 8) * 8))
        tile_rows = min(tile_rows, _round_up(n_tokens, 8))

        grid = (pl.cdiv(n_tokens, tile_rows),)

        kernel = functools.partial(
            _token_xent_kernel,
            pad_index=int(self.pad_index),
            n_tokens=n_tokens,
            tile_rows=tile_rows,
        )

        loss, count = pl.pallas_call(
            kernel,
            out_shape=(
                jax.ShapeDtypeStruct((1, 1), jnp.float32),
                jax.ShapeDtypeStruct((1, 1), jnp.int32),
            ),
            grid=grid,
            in_specs=[
                # Logits: (tile_rows, full vocab) — vocab on the lane axis.
                pl.BlockSpec((tile_rows, V), lambda i: (i, 0)),
                # Targets: one int per row; last dim 1 == full array dim.
                pl.BlockSpec((tile_rows, 1), lambda i: (i, 0)),
            ],
            out_specs=(
                pl.BlockSpec(memory_space=pltpu.SMEM),
                pl.BlockSpec(memory_space=pltpu.SMEM),
            ),
            compiler_params=pltpu.CompilerParams(
                # Outputs accumulate across the token-grid axis -> "arbitrary".
                dimension_semantics=("arbitrary",),
                vmem_limit_bytes=32 * 1024 * 1024,
            ),
        )(logits, tgt)

        # PyTorch returns count via .item() (host int); we return a device
        # int32 scalar instead so the whole op stays inside JAX.
        return loss[0, 0], count[0, 0]


if __name__ == "__main__":
    key = jax.random.PRNGKey(0)
    k_logits, k_tgt = jax.random.split(key)

    B, S, V = 2, 16, 128          # batch=2, seq=16, vocab=128 (lane-dense)
    pad_index = 0

    outputs = jax.random.normal(k_logits, (B, S, V), dtype=jnp.float32)
    targets = jax.random.randint(k_tgt, (B, S), 0, V, dtype=jnp.int32)
    # Force some pad positions so the ignore_index / count paths are exercised.
    targets = targets.at[:, -3:].set(pad_index)

    loss_fn = TokenCrossEntropyLoss(pad_index=pad_index)
    # tile_rows=8 -> 4 grid steps, exercising the resident-accumulator path.
    loss, count = loss_fn(outputs, targets, tile_rows=8)
    jax.block_until_ready((loss, count))

    # Pure-JAX reference check.
    logits_ref = outputs.reshape(B * S, V).astype(jnp.float32)
    tgt_ref = targets.reshape(B * S)
    lse_ref = jax.scipy.special.logsumexp(logits_ref, axis=-1)
    picked = jnp.take_along_axis(logits_ref, tgt_ref[:, None], axis=-1)[:, 0]
    mask = tgt_ref != pad_index
    ref_loss = jnp.sum(jnp.where(mask, lse_ref - picked, 0.0))
    ref_count = jnp.sum(mask.astype(jnp.int32))

    assert int(count) == int(ref_count), (int(count), int(ref_count))
    assert abs(float(loss) - float(ref_loss)) < 1e-3 * max(1.0, abs(float(ref_loss))), \
        (float(loss), float(ref_loss))

    print("KERNEL_OK")
</pallas_src>

<mosaic_0001>
module attributes {stable_mosaic.version = 11 : i64} {
  func.func @_token_xent_kernel(%arg0: i32, %arg1: memref<8x128xf32, #tpu.memory_space<vmem>>, %arg2: memref<8x1xi32, #tpu.memory_space<vmem>>, %arg3: memref<1x1xf32, #tpu.memory_space<smem>>, %arg4: memref<1x1xi32, #tpu.memory_space<smem>>) attributes {dimension_semantics = [#tpu.dimension_semantics<arbitrary>], iteration_bounds = array<i64: 4>, scalar_prefetch = 0 : i64, scratch_operands = 0 : i64, tpu.core_type = #tpu.core_type<tc>, window_params = [{transform_indices = @transform_0, window_bounds = array<i64: 8, 128>}, {transform_indices = @transform_1, window_bounds = array<i64: 8, 1>}, {transform_indices = @transform_2, window_bounds = array<i64: 1, 1>}, {transform_indices = @transform_3, window_bounds = array<i64: 1, 1>}]} {
    %c0_i32 = arith.constant 0 : i32
    %0 = arith.cmpi eq, %arg0, %c0_i32 : i32
    %1 = arith.extui %0 : i1 to i32
    %c0_i32_0 = arith.constant 0 : i32
    %2 = arith.cmpi ne, %1, %c0_i32_0 : i32
    scf.if %2 {
      %cst_19 = arith.constant 0.000000e+00 : f32
      %c0_20 = arith.constant 0 : index
      %c0_21 = arith.constant 0 : index
      %48 = memref.load %arg3[%c0_20, %c0_21] : memref<1x1xf32, #tpu.memory_space<smem>>
      memref.store %cst_19, %arg3[%c0_20, %c0_21] : memref<1x1xf32, #tpu.memory_space<smem>>
      %c0_i32_22 = arith.constant 0 : i32
      %c0_23 = arith.constant 0 : index
      %c0_24 = arith.constant 0 : index
      %49 = memref.load %arg4[%c0_23, %c0_24] : memref<1x1xi32, #tpu.memory_space<smem>>
      memref.store %c0_i32_22, %arg4[%c0_23, %c0_24] : memref<1x1xi32, #tpu.memory_space<smem>>
    } else {
    }
    %c0 = arith.constant 0 : index
    %c0_1 = arith.constant 0 : index
    %3 = vector.load %arg1[%c0, %c0_1] : memref<8x128xf32, #tpu.memory_space<vmem>>, vector<8x128xf32>
    %c0_2 = arith.constant 0 : index
    %c0_3 = arith.constant 0 : index
    %4 = vector.load %arg2[%c0_2, %c0_3] : memref<8x1xi32, #tpu.memory_space<vmem>>, vector<8x1xi32>
    %5 = tpu.iota {dimensions = array<i32: 0>} : vector<8x1xi32>
    %c8_i32 = arith.constant 8 : i32
    %6 = arith.muli %arg0, %c8_i32 : i32
    %7 = vector.broadcast %6 : i32 to vector<8x1xi32>
    %8 = arith.addi %5, %7 : vector<8x1xi32>
    %c0_i32_4 = arith.constant 0 : i32
    %9 = vector.broadcast %c0_i32_4 : i32 to vector<8x1xi32>
    %10 = arith.cmpi ne, %4, %9 : vector<8x1xi32>
    %c32_i32 = arith.constant 32 : i32
    %11 = vector.broadcast %c32_i32 : i32 to vector<8x1xi32>
    %12 = arith.cmpi slt, %8, %11 : vector<8x1xi32>
    %13 = arith.andi %10, %12 : vector<8x1xi1>
    %14 = tpu.iota {dimensions = array<i32: 1>} : vector<8x128xi32>
    %15 = vector.broadcast %4 : vector<8x1xi32> to vector<8x128xi32>
    %16 = arith.cmpi eq, %14, %15 : vector<8x128xi32>
    %cst = arith.constant 0.000000e+00 : f32
    %17 = vector.broadcast %cst : f32 to vector<8x128xf32>
    %18 = arith.select %16, %3, %17 : vector<8x128xi1>, vector<8x128xf32>
    %cst_5 = arith.constant dense<0.000000e+00> : vector<8xf32>
    %19 = vector.multi_reduction <add>, %18, %cst_5 [1] : vector<8x128xf32> to vector<8xf32>
    %20 = vector.shape_cast %19 : vector<8xf32> to vector<8x1xf32>
    %cst_6 = arith.constant dense<0xFF800000> : vector<8xf32>
    %21 = vector.multi_reduction <maximumf>, %3, %cst_6 [1] : vector<8x128xf32> to vector<8xf32>
    %22 = vector.shape_cast %21 : vector<8xf32> to vector<8x1xf32>
    %23 = vector.broadcast %22 : vector<8x1xf32> to vector<8x128xf32>
    %24 = arith.subf %3, %23 : vector<8x128xf32>
    %25 = math.exp %24 : vector<8x128xf32>
    %cst_7 = arith.constant dense<0.000000e+00> : vector<8xf32>
    %26 = vector.multi_reduction <add>, %25, %cst_7 [1] : vector<8x128xf32> to vector<8xf32>
    %27 = vector.shape_cast %26 : vector<8xf32> to vector<8x1xf32>
    %28 = math.log %27 : vector<8x1xf32>
    %29 = arith.addf %22, %28 : vector<8x1xf32>
    %30 = arith.subf %29, %20 : vector<8x1xf32>
    %c0_8 = arith.constant 0 : index
    %c0_9 = arith.constant 0 : index
    %31 = memref.load %arg3[%c0_8, %c0_9] : memref<1x1xf32, #tpu.memory_space<smem>>
    %cst_10 = arith.constant 0.000000e+00 : f32
    %32 = vector.broadcast %cst_10 : f32 to vector<8x1xf32>
    %33 = arith.select %13, %30, %32 : vector<8x1xi1>, vector<8x1xf32>
    %34 = vector.shape_cast %33 : vector<8x1xf32> to vector<1x8x1xf32>
    %cst_11 = arith.constant dense<0.000000e+00> : vector<1xf32>
    %35 = vector.multi_reduction <add>, %34, %cst_11 [1, 2] : vector<1x8x1xf32> to vector<1xf32>
    %36 = vector.shape_cast %35 : vector<1xf32> to vector<1x1x1xf32>
    %37 = vector.extract %36[0, 0, 0] : f32 from vector<1x1x1xf32>
    %38 = arith.addf %31, %37 : f32
    %c0_12 = arith.constant 0 : index
    %c0_13 = arith.constant 0 : index
    %39 = memref.load %arg3[%c0_12, %c0_13] : memref<1x1xf32, #tpu.memory_space<smem>>
    memref.store %38, %arg3[%c0_12, %c0_13] : memref<1x1xf32, #tpu.memory_space<smem>>
    %c0_14 = arith.constant 0 : index
    %c0_15 = arith.constant 0 : index
    %40 = memref.load %arg4[%c0_14, %c0_15] : memref<1x1xi32, #tpu.memory_space<smem>>
    %41 = arith.extui %13 : vector<8x1xi1> to vector<8x1xi32>
    %42 = vector.shape_cast %41 : vector<8x1xi32> to vector<1x8x1xi32>
    %cst_16 = arith.constant dense<0> : vector<1xi32>
    %43 = vector.multi_reduction <add>, %42, %cst_16 [1, 2] : vector<1x8x1xi32> to vector<1xi32>
    %44 = vector.shape_cast %43 : vector<1xi32> to vector<1x1x1xi32>
    %45 = vector.extract %44[0, 0, 0] : i32 from vector<1x1x1xi32>
    %46 = arith.addi %40, %45 : i32
    %c0_17 = arith.constant 0 : index
    %c0_18 = arith.constant 0 : index
    %47 = memref.load %arg4[%c0_17, %c0_18] : memref<1x1xi32, #tpu.memory_space<smem>>
    memref.store %46, %arg4[%c0_17, %c0_18] : memref<1x1xi32, #tpu.memory_space<smem>>
    return
  }
  func.func @transform_0(%arg0: i32) -> (i32, i32) {
    %c0_i32 = arith.constant 0 : i32
    %c0_i32_0 = arith.constant 0 : i32
    return %arg0, %c0_i32 : i32, i32
  }
  func.func @transform_1(%arg0: i32) -> (i32, i32) {
    %c0_i32 = arith.constant 0 : i32
    %c0_i32_0 = arith.constant 0 : i32
    return %arg0, %c0_i32 : i32, i32
  }
  func.func @transform_2(%arg0: i32) -> (i32, i32) {
    %c0_i32 = arith.constant 0 : i32
    %c0_i32_0 = arith.constant 0 : i32
    %c0_i32_1 = arith.constant 0 : i32
    return %c0_i32, %c0_i32_0 : i32, i32
  }
  func.func @transform_3(%arg0: i32) -> (i32, i32) {
    %c0_i32 = arith.constant 0 : i32
    %c0_i32_0 = arith.constant 0 : i32
    %c0_i32_1 = arith.constant 0 : i32
    return %c0_i32, %c0_i32_0 : i32, i32
  }
}

</mosaic_0001>

<bundles_post_ra>
// kernel: tpu_custom_call.1
= control target key start
LH: loop header
LB: loop body
LE: loop exit
PB: predicated region body
PF: predicated region fallthrough
CT: control target
= control target key end

     0   :  { %9 = vsyncpa [#allocation3], 0  ;;  %s503_s0 = inlined_call_operand.vmem [shape: f32[32,128], index: 0, kind: input, shape index: {}]   ;;  %s504_s1 = inlined_call_operand.vmem [shape: s32[32,1], index: 1, kind: input, shape index: {}]   ;;  %s505_s2 = inlined_call_operand.hbm [shape: f32[1,1], index: 2, kind: output, shape index: {0}]   ;;  %s506_s3 = inlined_call_operand.hbm [shape: s32[1,1], index: 3, kind: output, shape index: {1}]  }
   0x1   :  { %10 = vsyncpa [#allocation5], 0  ;;  %s451_s12 = smov 0  }
   0x2 LB: > { %s457_s13 = sadd.s32 4294967295, %s424_s12   ;;  %p333_p0 = scmp.ge.s32.totalorder %s424_s12, 1  ;;  %s424_s12 = sphi %s451_s12, %s16_s12  }
   0x3   : > { %p140_p1 = scmp.lt.s32.totalorder %s424_s12, 5 }
   0x5   : > { %p141_p2 = pnand %p333_p0, %p140_p1 }
   0x6   : > { %p162_p3 = scmp.lt.s32.totalorder (!%p141_p2), %s457_s13, 3  ;;  %s337_s22 = sshll.u32 (!%p141_p2), %s457_s13, 3 }
   0x7   : > { %144 = sbr.rel (%p141_p2) target bundleno = 464 (0x1d0), region = 28  ;;  %p359_p4 = scmp.eq.s32.totalorder (!%p141_p2), %s457_s13, 0 }
   0x8   : > { %s427_s23 = smov (!%p141_p2), 0.0   ;;  %s428_s24 = smov (!%p141_p2), 0  }
   0x9   : > { %s255_s29 = sshll.u32 (!%p141_p2), %s505_s2, 4  ;;  %p360_p5 = scmp.eq.s32.totalorder (!%p141_p2), %s457_s13, 3  ;;  %s256_s29 = int_to_ptr.hbm [resolvable:$true] %s255_s29 }
   0xa   : > { %s265_s6 = sshll.u32 (!%p141_p2), %s506_s3, 4  ;;  %s429_s10 = smov (!%p141_p2), [#allocation2]   ;;  %s266_s6 = int_to_ptr.hbm [resolvable:$true] %s265_s6 }
   0xb   : > { %s430_s11 = smov (!%p141_p2), [#allocation4]  }
   0xc   : > { %v426_v0 = vmov 0   ;;  %s163_s14 = scalar_select %p162_p3, %s457_s13, 3  ;;  %v180_v3 = vlaneseq  ;;  %v183_v5 = vstv %s337_s22  ;;  %vm210_vm3 = vcmask 7168  }
   0xd   : > { %377 = vset.pattern.permute.xlu0 %v426_v0  ;;  %349 = sst [smem:[#allocation2]] (%p359_p4), %s427_s23 }
   0xe   : > { %s334_s15 = sshll.u32 %s163_s14, 3  ;;  %v181_v4 = vshrl.u32 %v180_v3, 7  ;;  %v189_v16 = vand.u32 127, %v180_v3  ;;  %350 = sst [smem:[#allocation4]] (%p359_p4), %s428_s24 }
   0xf   : > { %s165_s18 = scalar_lea.vmem %s503_s0, %s334_s15  ;;  %s169_s21 = scalar_lea.vmem %s504_s1, %s334_s15 }
  0x10   : > { %v178_v1 = vld [vmem:[%s165_s18] sm:$0xff]  ;;  %v184_v6 = vadd.s32 %v183_v5, %v181_v4  ;;  %s208_s25 = sld [smem:[#allocation2]] }
  0x11   : > { %197 = vmax.xlane.f32.xlu0 %v178_v1  ;;  %v179_v2 = vld [vmem:[%s169_s21] sm:$0xff]  ;;  %s224_s26 = sld [smem:[#allocation4]] }
  0x12   : > { %vm185_vm0 = vcmp.ne.s32.totalorder %v179_v2, 0  ;;  %vm186_vm1 = vcmp.lt.s32.totalorder %v184_v6, 32 }
  0x13   : > { %vm470_vm2 = vmand %vm185_vm0, %vm186_vm1 }
  0x14   : > { %v225_v8 = vsel %vm470_vm2, 1, %v426_v0 }
  0x15   : > { %v226_v9 = vsel %vm210_vm3, %v225_v8, 0 }
  0x16   : > { %v228_v10 = vshrl.u32 %v226_v9, 16  ;;  %v227_v19 = vand.u32 65535, %v226_v9 }
  0x18   : > { %v230_v11 = vcvt.s32.f32 %v228_v10  ;;  %v229_v20 = vcvt.s32.f32 %v227_v19 }
  0x1a   : > { %233 = vadd.xlane.f32.xlu2 %v230_v11 }
  0x22   : > { %231 = vadd.xlane.f32.xlu2 %v229_v20 }
  0x25   : > { %191 = vperm.xlu0 %377, %v179_v2  }
  0x84   : > { %v198_v12 = vpop.xlane.xlu0 %197 }
  0x85   : > { %v199_v13 = vsub.f32 %v178_v1, %v198_v12 }
  0x87   : > { %v200_v14 = vmul.f32 1.442695, %v199_v13 }
  0x89   : > { %378 = vpow2.f32 %v200_v14 }
  0x8d   : > { %v234_v29 = vpop.xlane.xlu2 %233 }
  0x8e   : > { %v236_v30 = vcvt.f32.s32 %v234_v29 }
  0x8f   : > { %v379_v15 = vpop.eup %378 }
  0x90   : > { %202 = vadd.xlane.f32.xlu1 %v379_v15  ;;  %v237_v32 = vshll.u32 %v236_v30, 16 }
  0x95   : > { %v232_v31 = vpop.xlane.xlu2 %231 }
  0x96   : > { %v235_v33 = vcvt.f32.s32 %v232_v31 }
  0x97   : > { %v192_v17 = vpop.permute.xlu0 %191 }
  0x98   : > { %vm193_vm4 = vcmp.eq.s32.totalorder %v189_v16, %v192_v17  ;;  %v238_v34 = vadd.s32 %v237_v32, %v235_v33 }
  0x99   : > { %v194_v18 = vsel %vm193_vm4, %v178_v1, 0.0 }
  0x9a   : > { %195 = vadd.xlane.f32.xlu1 %v194_v18  ;;  %v239_v35 = vrot.slane %v238_v34, 4 }
  0x9c   : > { %v240_v36 = vadd.s32 %v239_v35, %v238_v34 }
  0x9e   : > { %v241_v38 = vrot.slane %v240_v36, 2 }
  0xa0   : > { %v242_v41 = vadd.s32 %v241_v38, %v240_v36 }
  0xa2   : > { %v243_v44 = vrot.slane %v242_v41, 1 }
  0xa4   : > { %v244_v47 = vadd.s32 %v243_v44, %v242_v41 }
 0x103   : > { %v203_v21 = vpop.xlane.xlu1 %202 }
 0x104   : > { %380 = vlog2.f32 %v203_v21 }
 0x10a   : > { %v381_v22 = vpop.eup %380 }
 0x10b   : > { %v205_v23 = vmul.f32 0.6931472, %v381_v22 }
 0x10d   : > { %v206_v24 = vadd.f32 %v205_v23, %v198_v12  ;;  %v196_v25 = vpop.xlane.xlu1 %195 }
 0x10f   : > { %v207_v26 = vsub.f32 %v206_v24, %v196_v25 }
 0x111   : > { %v209_v27 = vsel %vm470_vm2, %v207_v26, 0.0 }
 0x112   : > { %v211_v28 = vsel %vm210_vm3, %v209_v27, 0.0 }
 0x113   : > { %212 = vadd.xlane.f32.xlu1 %v211_v28 }
 0x186   : > { %v213_v37 = vpop.xlane.xlu1 %212 }
 0x187   : > { %v214_v39 = vrot.slane %v213_v37, 4 }
 0x189   : > { %v215_v40 = vadd.f32 %v214_v39, %v213_v37 }
 0x18b   : > { %v216_v42 = vrot.slane %v215_v40, 2 }
 0x18d   : > { %v217_v43 = vadd.f32 %v216_v42, %v215_v40 }
 0x18f   : > { %v218_v45 = vrot.slane %v217_v43, 1 }
 0x191   : > { %v219_v46 = vadd.f32 %v218_v45, %v217_v43 }
 0x193   : > { %344 = vpush %v219_v46 }
 0x194   : > { %346 = vpush %v244_v47 }
 0x1c4   : > { %s345_s30 = spop %344 }
 0x1c5   : > { %s221_s7 = sadd.f32 %s345_s30, %s208_s25  ;;  %s347_s8 = spop %346 }
 0x1c6   : > { %s246_s9 = sadd.s32 %s347_s8, %s224_s26 }
 0x1c7   : > { %248 = sst [smem:[#allocation4]] %s246_s9 }
 0x1c8   : > { %223 = sst [smem:[#allocation2]] %s221_s7 }
 0x1c9   : > { %352 = dma.smem_to_hbm (%p360_p5), %s429_s10, 16, %s256_s29, [#allocation3]  }
 0x1ca   : > { %354 = dma.smem_to_hbm (%p360_p5), %s430_s11, 16, %s266_s6, [#allocation5]  }
 0x1cb   : > { %415 = dma.done.wait (%p360_p5), [#allocation3], 16  }
 0x1cc   : > { %417 = vsyncadd (%p360_p5), [#allocation3], 4294967280 }
 0x1cd   : > { %419 = dma.done.wait (%p360_p5), [#allocation5], 16  }
 0x1ce   : > { %421 = vsyncadd (%p360_p5), [#allocation5], 4294967280 }
 0x1cf   : > { %279 = sfence }
 0x1d0 PF: > { %s16_s12 = sadd.s32 1, %s424_s12  }
 0x1d1   : > { %p13_p6 = scmp.ge.s32.totalorder %s16_s12, 6  }
 0x1d3   :  { %15 = sbr.rel (!%p13_p6) target bundleno = 2 (0x2), region = 74 }
 0x1d8   :  { %285 = vsyncpa [#allocation3], 1 }
 0x1d9   :  { %287 = vsyncpa [#allocation3 + $0x1], 1 }
 0x1da   :  { %288 = vsyncpa [#allocation5], 1 }

</bundles_post_ra>
